<compile_context>
chip_gen: v7x
topology: tpu7x:2x2x1
jax: 0.10.0
libtpu: 0.0.40
codegen_flags: <defaults>
</compile_context>

<pallas_src>
import jax
import jax.numpy as jnp
from jax.experimental import pallas as pl
from jax.experimental.pallas import tpu as pltpu


def _make_hbm_copy_kernel(n):
    """Kernel that copies n arrays HBM -> HBM via async DMA in one launch."""

    def kernel(*refs):
        in_refs = refs[:n]
        out_refs = refs[n:2 * n]
        sems = refs[2 * n]  # (n,) DMA semaphores
        copies = [
            pltpu.make_async_copy(in_refs[i], out_refs[i], sems.at[i])
            for i in range(n)
        ]
        # Issue all DMAs, then wait for all -> overlapped transfers.
        for c in copies:
            c.start()
        for c in copies:
            c.wait()

    return kernel


def _passthrough_pallas(*arrays):
    """Single fused pallas_call: each array is copied HBM->HBM (no VMEM)."""
    n = len(arrays)
    return pl.pallas_call(
        _make_hbm_copy_kernel(n),
        out_shape=tuple(jax.ShapeDtypeStruct(a.shape, a.dtype) for a in arrays),
        in_specs=[pl.BlockSpec(memory_space=pl.ANY)] * n,
        out_specs=tuple(pl.BlockSpec(memory_space=pl.ANY) for _ in range(n)),
        scratch_shapes=[pltpu.SemaphoreType.DMA((n,))],
        compiler_params=pltpu.CompilerParams(has_side_effects=True),
    )(*arrays)


def _lane_dense_2d(a: jax.Array) -> jax.Array:
    """Flatten to a lane-dense 2-D slab (last dim 128) when possible."""
    total = a.size
    if total % 128 == 0:
        return a.reshape(total // 128, 128)
    if a.ndim >= 2:
        return a.reshape(-1, a.shape[-1])
    return a.reshape(1, -1)


class DistillerParams:
    """Deterministic stand-in for the nn.Parameters in Distiller.__init__."""

    def __init__(self, state_c, state_h, state_w, action_space, batch_size,
                 inner_lr=0.02, inner_momentum=0.5, conditional_generation=True,
                 key=None):
        if key is None:
            key = jax.random.PRNGKey(0)
        kx, ky = jax.random.split(key)
        self.conditional_generation = conditional_generation
        # self.x = nn.Parameter(torch.randn((batch_size, state_c, state_h, state_w)))
        self.x = jax.random.normal(
            kx, (batch_size, state_c, state_h, state_w), dtype=jnp.float32)
        if not conditional_generation:
            # self.y = nn.Parameter(torch.randn((batch_size, action_space)))
            self.y = jax.random.normal(
                ky, (batch_size, action_space), dtype=jnp.float32)
        else:
            self.y = None
        # scalar "hyper-parameter" parameters (not used in forward)
        self.inner_lr = jnp.float32(inner_lr) if inner_lr is not None else None
        self.inner_momentum = (
            jnp.float32(inner_momentum) if inner_momentum is not None else None)


def distiller_forward(params: DistillerParams):
    """Pallas-backed equivalent of Distiller.forward()."""
    B, C, H, W = params.x.shape
    x2d = _lane_dense_2d(params.x)

    if params.conditional_generation:
        (x_out,) = _passthrough_pallas(x2d)
        return x_out.reshape(B, C, H, W)

    # Fused single launch for both returned parameters.
    x_out, y_out = _passthrough_pallas(x2d, params.y)
    return (x_out.reshape(B, C, H, W), y_out)


if __name__ == "__main__":
    # Small, forward-consistent shapes.
    batch_size = 2
    state_c, state_h, state_w = 4, 16, 16
    action_space = 6

    key = jax.random.PRNGKey(0)

    # Case 1: conditional_generation=True -> forward() returns x.
    params_cond = DistillerParams(state_c, state_h, state_w, action_space,
                                  batch_size, conditional_generation=True,
                                  key=key)
    out_x = distiller_forward(params_cond)
    out_x = jax.block_until_ready(out_x)
    assert out_x.shape == (batch_size, state_c, state_h, state_w)
    assert jnp.allclose(out_x, params_cond.x)

    # Case 2: conditional_generation=False -> forward() returns (x, y).
    params_uncond = DistillerParams(state_c, state_h, state_w, action_space,
                                    batch_size, conditional_generation=False,
                                    key=key)
    out_x2, out_y = distiller_forward(params_uncond)
    out_x2 = jax.block_until_ready(out_x2)
    out_y = jax.block_until_ready(out_y)
    assert out_x2.shape == (batch_size, state_c, state_h, state_w)
    assert out_y.shape == (batch_size, action_space)
    assert jnp.allclose(out_x2, params_uncond.x)
    assert jnp.allclose(out_y, params_uncond.y)

    print("KERNEL_OK")
</pallas_src>

<mosaic_0001>
module attributes {stable_mosaic.version = 11 : i64} {
  func.func @kernel(%arg0: memref<16x128xf32, #tpu.memory_space<any>>, %arg1: memref<16x128xf32, #tpu.memory_space<any>>, %arg2: memref<1x!tpu.dma_semaphore, #tpu.memory_space<semaphore_mem>>) attributes {dimension_semantics = [], scalar_prefetch = 0 : i64, scratch_operands = 1 : i64, tpu.core_type = #tpu.core_type<tc>} {
    %c0_i32 = arith.constant 0 : i32
    %0 = tpu.memref_slice %arg2[%c0_i32] : memref<1x!tpu.dma_semaphore, #tpu.memory_space<semaphore_mem>> -> memref<1x!tpu.dma_semaphore, #tpu.memory_space<semaphore_mem>>
    %1 = tpu.memref_squeeze %0 : memref<1x!tpu.dma_semaphore, #tpu.memory_space<semaphore_mem>> -> memref<!tpu.dma_semaphore, #tpu.memory_space<semaphore_mem>>
    tpu.enqueue_dma source(%arg0 : memref<16x128xf32, #tpu.memory_space<any>>) target(%arg1 : memref<16x128xf32, #tpu.memory_space<any>>) target_semaphore(%1 : memref<!tpu.dma_semaphore, #tpu.memory_space<semaphore_mem>>)
    %c0_i32_0 = arith.constant 0 : i32
    %2 = tpu.memref_slice %arg2[%c0_i32_0] : memref<1x!tpu.dma_semaphore, #tpu.memory_space<semaphore_mem>> -> memref<1x!tpu.dma_semaphore, #tpu.memory_space<semaphore_mem>>
    %3 = tpu.memref_squeeze %2 : memref<1x!tpu.dma_semaphore, #tpu.memory_space<semaphore_mem>> -> memref<!tpu.dma_semaphore, #tpu.memory_space<semaphore_mem>>
    tpu.wait_dma2 semaphore(%3 : memref<!tpu.dma_semaphore, #tpu.memory_space<semaphore_mem>>) src(%arg0 : memref<16x128xf32, #tpu.memory_space<any>>) dst(%arg1 : memref<16x128xf32, #tpu.memory_space<any>>)
    return
  }
}

</mosaic_0001>

<bundles_post_ra>
// kernel: tpu_custom_call.1
= control target key start
LH: loop header
LB: loop body
LE: loop exit
PB: predicated region body
PF: predicated region fallthrough
CT: control target
= control target key end

     0   :  { %s34_s6 = smov [#allocation2]   ;;  %s35_s7 = smov [#allocation3]   ;;  %s53_s0 = inlined_call_operand.hbm [shape: f32[16,128], index: 0, kind: input, shape index: {}]   ;;  %s54_s1 = inlined_call_operand.hbm [shape: f32[16,128], index: 1, kind: output, shape index: {}]  }
   0x1   :  { %s36_s8 = smov 0  }
   0x2   :  { %18 = dma.general %s53_s0, 256, %s54_s1, %s34_s6, %s35_s7, [#allocation4], %s36_s8, 0  }
   0x3   :  { %32 = dma.done.wait [#allocation2], 256 }
   0x4   :  { %33 = vsyncadd [#allocation2], 4294967040 }
   0x5   :  { %22 = vsyncmov [#allocation2] }
   0x8   :  { %s23_s13 = vpop.sfrf %22 }
   0x9   :  { %p28_p0 = scmp.ne.s32.totalorder %s23_s13, 0 }
   0xb   :  { %27 = shalt.err (%p28_p0)  }

</bundles_post_ra>
